<compile_context>
chip_gen: v5e
topology: v5e:2x2
jax: 0.10.0
libtpu: 0.0.40
codegen_flags: <defaults>
</compile_context>

<pallas_src>
import math
import functools

import jax
import jax.numpy as jnp
from jax.experimental import pallas as pl
from jax.experimental.pallas import tpu as pltpu


# ----------------------------- kernels ------------------------------------ #

def _pe_add_kernel(x_ref, pe_ref, o_ref):
    # x_ref: (TS, B, D); pe_ref: (TS, 1, D) -> broadcast over batch.
    o_ref[...] = (x_ref[...] + pe_ref[...]).astype(o_ref.dtype)


def _pe_add_dropout_kernel(x_ref, pe_ref, bits_ref, o_ref, *, threshold, scale):
    # bits_ref: (TS, B, D) uint32.  keep iff bits >= threshold  (P = 1 - p).
    y = x_ref[...] + pe_ref[...]
    keep = bits_ref[...] >= jnp.uint32(threshold)
    y = jnp.where(keep, y * jnp.asarray(scale, y.dtype), jnp.zeros_like(y))
    o_ref[...] = y.astype(o_ref.dtype)


# --------------------------- table builder --------------------------------- #

def make_positional_encoding_table(d_model: int, max_len: int = 5000,
                                   dtype=jnp.float32):
    """Deterministic buffer identical to the PyTorch __init__."""
    position = jnp.arange(max_len, dtype=jnp.float32)[:, None]          # (L, 1)
    div_term = jnp.exp(
        jnp.arange(0, d_model, 2, dtype=jnp.float32)
        * (-math.log(10000.0) / d_model))                               # (D/2,)
    ang = position * div_term                                           # (L, D/2)
    pe = jnp.zeros((max_len, 1, d_model), dtype=jnp.float32)
    pe = pe.at[:, 0, 0::2].set(jnp.sin(ang))
    pe = pe.at[:, 0, 1::2].set(jnp.cos(ang))
    return pe.astype(dtype)


# ------------------------------ wrapper ------------------------------------ #

def positional_encoding(x, pe, *, p: float = 0.1, training: bool = True,
                        rng_key=None):
    """x: (seq_len, batch, d_model). Returns dropout(x + pe[:seq_len])."""
    S, B, D = x.shape
    assert pe.ndim == 3 and pe.shape[1] == 1 and pe.shape[2] == D
    assert pe.shape[0] >= S, "sequence longer than positional table"
    if pe.dtype != x.dtype:
        # keep the add in x's dtype (avoid silent f32 promotion for bf16 x)
        pe = pe.astype(x.dtype)

    itemsize = x.dtype.itemsize
    # ~2 MiB per x/out tile: safe under the 16 MiB scoped default on v5e and
    # leaves full pipeline depth on v6e/v7x.
    row_bytes = max(1, B * D * itemsize)
    ts = max(1, min(S, (2 * 1024 * 1024) // row_bytes))
    grid = (pl.cdiv(S, ts),)

    x_spec = pl.BlockSpec((ts, B, D), lambda i: (i, 0, 0))
    pe_spec = pl.BlockSpec((ts, 1, D), lambda i: (i, 0, 0))
    out_spec = pl.BlockSpec((ts, B, D), lambda i: (i, 0, 0))

    use_dropout = bool(training) and float(p) > 0.0

    flops = S * B * D + (2 * S * B * D if use_dropout else 0)
    bytes_accessed = 2 * S * B * D * itemsize + S * D * itemsize
    if use_dropout:
        bytes_accessed += S * B * D * 4  # uint32 random bits

    compiler_params = pltpu.CompilerParams(
        dimension_semantics=("parallel",),        # megacore-shard on v7x
        vmem_limit_bytes=32 * 1024 * 1024,        # headroom for double buffers
    )
    cost = pl.CostEstimate(flops=flops, transcendentals=0,
                           bytes_accessed=bytes_accessed)

    if not use_dropout:
        return pl.pallas_call(
            _pe_add_kernel,
            out_shape=jax.ShapeDtypeStruct((S, B, D), x.dtype),
            grid=grid,
            in_specs=[x_spec, pe_spec],
            out_specs=out_spec,
            compiler_params=compiler_params,
            cost_estimate=cost,
        )(x, pe)

    if rng_key is None:
        rng_key = jax.random.PRNGKey(0)
    bits = jax.random.bits(rng_key, (S, B, D), dtype=jnp.uint32)
    threshold = min(int(round(float(p) * 2.0 ** 32)), 2 ** 32 - 1)
    kernel = functools.partial(_pe_add_dropout_kernel,
                               threshold=threshold,
                               scale=float(1.0 / (1.0 - float(p))))
    bits_spec = pl.BlockSpec((ts, B, D), lambda i: (i, 0, 0))

    return pl.pallas_call(
        kernel,
        out_shape=jax.ShapeDtypeStruct((S, B, D), x.dtype),
        grid=grid,
        in_specs=[x_spec, pe_spec, bits_spec],
        out_specs=out_spec,
        compiler_params=compiler_params,
        cost_estimate=cost,
    )(x, pe, bits)


# ------------------------------- demo --------------------------------------- #

if __name__ == "__main__":
    seq_len, batch, d_model = 8, 2, 32
    p = 0.1

    key = jax.random.PRNGKey(0)
    x = jax.random.normal(key, (seq_len, batch, d_model), dtype=jnp.float32)
    pe = make_positional_encoding_table(d_model, max_len=5000,
                                        dtype=jnp.float32)

    # Eval mode (dropout = identity): must equal x + pe[:S].
    y_eval = jax.block_until_ready(
        positional_encoding(x, pe, p=p, training=False))
    ref_eval = x + pe[:seq_len]
    assert y_eval.shape == (seq_len, batch, d_model)
    assert jnp.allclose(y_eval, ref_eval, atol=1e-6), "eval-mode mismatch"

    # Training mode: dropout mask is derived from externally generated bits,
    # so the result is exactly reproducible in pure JAX.
    drop_key = jax.random.PRNGKey(1234)
    y_train = jax.block_until_ready(
        positional_encoding(x, pe, p=p, training=True, rng_key=drop_key))
    bits_ref = jax.random.bits(drop_key, (seq_len, batch, d_model),
                               dtype=jnp.uint32)
    threshold = min(int(round(p * 2.0 ** 32)), 2 ** 32 - 1)
    keep_ref = bits_ref >= jnp.uint32(threshold)
    ref_train = jnp.where(keep_ref, ref_eval * (1.0 / (1.0 - p)),
                          jnp.zeros_like(ref_eval))
    assert y_train.shape == (seq_len, batch, d_model)
    assert jnp.allclose(y_train, ref_train, atol=1e-6), "train-mode mismatch"
    assert bool(jnp.all(jnp.isfinite(y_train)))

    print("KERNEL_OK")
</pallas_src>

<mosaic_0001>
module attributes {stable_mosaic.version = 11 : i64} {
  func.func @_pe_add_kernel(%arg0: i32, %arg1: memref<8x2x32xf32, #tpu.memory_space<vmem>>, %arg2: memref<8x1x32xf32, #tpu.memory_space<vmem>>, %arg3: memref<8x2x32xf32, #tpu.memory_space<vmem>>) attributes {dimension_semantics = [#tpu.dimension_semantics<parallel>], iteration_bounds = array<i64: 1>, scalar_prefetch = 0 : i64, scratch_operands = 0 : i64, tpu.core_type = #tpu.core_type<tc>, window_params = [{transform_indices = @transform_0, window_bounds = array<i64: 8, 2, 32>}, {transform_indices = @transform_1, window_bounds = array<i64: 8, 1, 32>}, {transform_indices = @transform_2, window_bounds = array<i64: 8, 2, 32>}]} {
    %c0 = arith.constant 0 : index
    %c0_0 = arith.constant 0 : index
    %c0_1 = arith.constant 0 : index
    %0 = vector.load %arg1[%c0, %c0_0, %c0_1] : memref<8x2x32xf32, #tpu.memory_space<vmem>>, vector<8x2x32xf32>
    %c0_2 = arith.constant 0 : index
    %c0_3 = arith.constant 0 : index
    %c0_4 = arith.constant 0 : index
    %1 = vector.load %arg2[%c0_2, %c0_3, %c0_4] : memref<8x1x32xf32, #tpu.memory_space<vmem>>, vector<8x1x32xf32>
    %2 = vector.broadcast %1 : vector<8x1x32xf32> to vector<8x2x32xf32>
    %3 = arith.addf %0, %2 : vector<8x2x32xf32>
    %c0_5 = arith.constant 0 : index
    %c0_6 = arith.constant 0 : index
    %c0_7 = arith.constant 0 : index
    %4 = vector.load %arg3[%c0_5, %c0_6, %c0_7] : memref<8x2x32xf32, #tpu.memory_space<vmem>>, vector<8x2x32xf32>
    tpu.vector_store %arg3[%c0_5, %c0_6, %c0_7], %3 {strides = array<i32>} : memref<8x2x32xf32, #tpu.memory_space<vmem>>, vector<8x2x32xf32>,
    return
  }
  func.func @transform_0(%arg0: i32) -> (i32, i32, i32) {
    %c0_i32 = arith.constant 0 : i32
    %c0_i32_0 = arith.constant 0 : i32
    %c0_i32_1 = arith.constant 0 : i32
    return %arg0, %c0_i32, %c0_i32_0 : i32, i32, i32
  }
  func.func @transform_1(%arg0: i32) -> (i32, i32, i32) {
    %c0_i32 = arith.constant 0 : i32
    %c0_i32_0 = arith.constant 0 : i32
    %c0_i32_1 = arith.constant 0 : i32
    return %arg0, %c0_i32, %c0_i32_0 : i32, i32, i32
  }
  func.func @transform_2(%arg0: i32) -> (i32, i32, i32) {
    %c0_i32 = arith.constant 0 : i32
    %c0_i32_0 = arith.constant 0 : i32
    %c0_i32_1 = arith.constant 0 : i32
    return %arg0, %c0_i32, %c0_i32_0 : i32, i32, i32
  }
}

</mosaic_0001>

<bundles_post_ra>
// kernel: tpu_custom_call.1
= control target key start
LH: loop header
LB: loop body
LE: loop exit
PB: predicated region body
PF: predicated region fallthrough
CT: control target
= control target key end

     0   :  { %vm60_vm0 = vcmask 254976   ;;  %s201_s0 = inlined_call_operand.vmem [shape: f32[8,2,32], index: 0, kind: input, shape index: {}]   ;;  %s202_s1 = inlined_call_operand.vmem [shape: f32[5000,1,32], index: 1, kind: input, shape index: {}]   ;;  %s203_s2 = inlined_call_operand.hbm [shape: f32[8,2,32], index: 2, kind: output, shape index: {}]  }
   0x1   :  { %v12_v0 = vld [vmem:[%s201_s0] sm:$0x3]  ;;  %v13_v2 = vld [vmem:[%s201_s0 + $0x2] sm:$0x3]  ;;  %v14_v5 = vld [vmem:[%s201_s0 + $0x4] sm:$0x3] }
   0x2   :  { %v90_v1 = vld [vmem:[%s202_s1] ss:$0 sm:$0xff]  ;;  %v91_v4 = vld [vmem:[%s202_s1 + $0x1] ss:$0 sm:$0xff]  ;;  %v92_v6 = vld [vmem:[%s202_s1 + $0x2] ss:$0 sm:$0xff] }
   0x3   :  { %v52_v3 = vadd.f32 %v90_v1, %v12_v0  ;;  %v15_v7 = vld [vmem:[%s201_s0 + $0x6] sm:$0x3]  ;;  %v53_v8 = vadd.f32 %v91_v4, %v13_v2  ;;  %v93_v9 = vld [vmem:[%s202_s1 + $0x3] ss:$0 sm:$0xff]  ;;  %v16_v10 = vld [vmem:[%s201_s0 + $0x8] sm:$0x3]  ;;  %v54_v11 = vadd.f32 %v92_v6, %v14_v5 }
   0x4   :  { %v94_v12 = vld [vmem:[%s202_s1 + $0x4] ss:$0 sm:$0xff]  ;;  %v17_v13 = vld [vmem:[%s201_s0 + $0xa] sm:$0x3]  ;;  %v55_v14 = vadd.f32 %v93_v9, %v15_v7  ;;  %v95_v15 = vld [vmem:[%s202_s1 + $0x5] ss:$0 sm:$0xff] }
   0x5   :  { %61 = vst.msk [vmem:[#allocation2] sm:$0x3] %vm60_vm0, %v52_v3  ;;  %v56_v16 = vadd.f32 %v94_v12, %v16_v10  ;;  %v18_v17 = vld [vmem:[%s201_s0 + $0xc] sm:$0x3]  ;;  %v57_v18 = vadd.f32 %v95_v15, %v17_v13  ;;  %v96_v19 = vld [vmem:[%s202_s1 + $0x6] ss:$0 sm:$0xff] }
   0x6   :  { %62 = vst.msk [vmem:[#allocation2 + $0x2] sm:$0x3] %vm60_vm0, %v53_v8  ;;  %v19_v20 = vld [vmem:[%s201_s0 + $0xe] sm:$0x3]  ;;  %v97_v21 = vld [vmem:[%s202_s1 + $0x7] ss:$0 sm:$0xff]  ;;  %v58_v22 = vadd.f32 %v96_v19, %v18_v17 }
   0x7   :  { %63 = vst.msk [vmem:[#allocation2 + $0x4] sm:$0x3] %vm60_vm0, %v54_v11 }
   0x8   :  { %64 = vst.msk [vmem:[#allocation2 + $0x6] sm:$0x3] %vm60_vm0, %v55_v14 }
   0x9   :  { %65 = vst.msk [vmem:[#allocation2 + $0x8] sm:$0x3] %vm60_vm0, %v56_v16 }
   0xa   :  { %66 = vst.msk [vmem:[#allocation2 + $0xa] sm:$0x3] %vm60_vm0, %v57_v18 }
   0xb   :  { %7 = vsyncpa [#allocation3], 0  ;;  %s124_s13 = smov [#allocation2]   ;;  %s75_s17 = sshll.u32 %s203_s2, 4  ;;  %v59_v23 = vadd.f32 %v97_v21, %v19_v20  ;;  %67 = vst.msk [vmem:[#allocation2 + $0xc] sm:$0x3] %vm60_vm0, %v58_v22  ;;  %s76_s17 = int_to_ptr.hbm [resolvable:$true] %s75_s17 }
   0xc   :  { %s73_s14 = sshll.u32 %s124_s13, 4  ;;  %s125_s0 = smov 32   ;;  %s74_s14 = int_to_ptr.vmem [resolvable:$true] %s73_s14 }
   0xd   :  { %68 = vst.msk [vmem:[#allocation2 + $0xe] sm:$0x3] %vm60_vm0, %v59_v23  ;;  %s126_s18 = smov 2  }
   0xe   :  { %81 = dma.vmem_to_hbm [thread:$0]  %s74_s14, 256, %s76_s17, [#allocation3], %s125_s0, %s125_s0, %s126_s18  }
   0xf   :  { %122 = dma.done.wait [#allocation3], 256  }
  0x10   :  { %123 = vsyncadd [#allocation3], 4294967040 }
  0x11   :  { %86 = vsyncpa [#allocation3], 1 }

</bundles_post_ra>
